<compile_context>
chip_gen: v6e
topology: v6e:2x2x1
jax: 0.10.0
libtpu: 0.0.40
codegen_flags: <defaults>
</compile_context>

<pallas_src>
import math

import jax
import jax.numpy as jnp
from jax.experimental import pallas as pl
from jax.experimental.pallas import tpu as pltpu


# ----------------------------- kernel ---------------------------------------

def pe_add_kernel(x_ref, pe_ref, o_ref):
    # x_ref / o_ref: (TB, TF) tile of the flattened (B, S*D) tensor.
    # pe_ref:        (1, TF) tile of the flattened pe table -> broadcasts over rows.
    # pe is pre-cast to x.dtype in the wrapper, so this is a single VPU add.
    o_ref[...] = x_ref[...] + pe_ref[...]


# ------------------- pe buffer (register_buffer equivalent) ------------------

def make_positional_encoding(d_model, max_len=5000):
    """Build the pe buffer exactly like the PyTorch module's __init__."""
    position = jnp.arange(0, max_len, dtype=jnp.float32)[:, None]            # (L, 1)
    div_term = jnp.exp(jnp.arange(0, d_model, 2, dtype=jnp.float32)
                       * -(math.log(10000.0) / d_model))                     # (D/2,)
    angles = position * div_term                                             # (L, D/2)
    pe = jnp.zeros((max_len, d_model), jnp.float32)
    pe = pe.at[:, 0::2].set(jnp.sin(angles))
    pe = pe.at[:, 1::2].set(jnp.cos(angles))
    return pe[None]                                                          # (1, L, D)


# ----------------------------- tiling helpers --------------------------------

def _vmem_limit_bytes():
    try:
        cap = int(pltpu.get_tpu_info().vmem_capacity_bytes)   # 64 MiB v7x, 128 MiB v5e/v6e
    except Exception:
        cap = 64 << 20                                        # conservative (v7x per-TC)
    return int(min(max(cap * 3 // 4, 32 << 20), 96 << 20))


def _pick_tiles(B, F, itemsize, target_block_bytes):
    """Pick (batch_tile, lane_tile) for the flattened (B, F=S*D) view."""
    sub = max(8, 32 // itemsize)          # sublane packing: f32->8, bf16->16, i8/fp8->32

    # Lane tile: full dim when it fits, else a multiple of 128 (partial last block OK).
    lanes_cap = max(128, target_block_bytes // (sub * itemsize))
    tf = F if F <= lanes_cap else (lanes_cap // 128) * 128

    # Batch tile: as many rows as the per-block byte budget allows (multiple of sub).
    rows_cap = max(1, target_block_bytes // (tf * itemsize))
    tb = max(sub, (rows_cap // sub) * sub)
    if tb >= B:
        tb = B                            # full dim -> no divisibility constraint

    # v7x has 2 TensorCores sharing HBM: when there is real work but the grid would
    # collapse to a single step, split so both cores (and the pipeline) get work.
    if tb >= B and tf >= F and B * F * itemsize >= (1 << 20):
        if F % 256 == 0:
            tf = F // 2                   # still a multiple of 128
        elif B >= 2 * sub:
            tb = ((B // 2 + sub - 1) // sub) * sub
    return tb, tf


# ----------------------------- wrapper ----------------------------------------

def positional_encoding(x, pe, *, force_kernel=False, target_block_bytes=8 << 20):
    """x: (B, S, D); pe: (1, max_len, D). Returns x + pe[:, :S] (dropout = identity)."""
    # TODO(synk): nn.Dropout is identity in the deterministic/eval forward; a
    # training-mode path would use pltpu.prng_seed / prng_random_bits in-kernel
    # with 1/(1-p) scaling.
    B, S, D = x.shape
    F = S * D
    itemsize = jnp.dtype(x.dtype).itemsize

    pe_slice = pe[:, :S, :].astype(x.dtype)          # pe[:, :x.size(1)], pre-cast once

    # Tiny shapes: the broadcast-add fuses into neighbours for free in plain XLA;
    # a pallas_call launch + DMA descriptors would dominate at KB scale.
    if not force_kernel and B * F * itemsize < (256 << 10):
        return x + pe_slice

    x2 = x.reshape(B, F)                              # lane-dense flattened last dim
    pe2 = pe_slice.reshape(1, F)

    tb, tf = _pick_tiles(B, F, itemsize, target_block_bytes)
    grid = (pl.cdiv(B, tb), pl.cdiv(F, tf))
    single_buffer_pe = grid[1] == 1                   # pe block grid-constant -> 1 buffer

    cost = pl.CostEstimate(flops=B * F, transcendentals=0,
                           bytes_accessed=(2 * B * F + F) * itemsize)
    cparams = pltpu.CompilerParams(
        dimension_semantics=("parallel", "parallel"),
        vmem_limit_bytes=_vmem_limit_bytes())

    def _run(pe_pipeline_mode):
        if pe_pipeline_mode is None:
            pe_spec = pl.BlockSpec((1, tf), lambda i, j: (0, j))
        else:
            pe_spec = pl.BlockSpec((1, tf), lambda i, j: (0, j),
                                   pipeline_mode=pe_pipeline_mode)
        return pl.pallas_call(
            pe_add_kernel,
            out_shape=jax.ShapeDtypeStruct((B, F), x.dtype),
            grid=grid,
            in_specs=[pl.BlockSpec((tb, tf), lambda i, j: (i, j)), pe_spec],
            out_specs=pl.BlockSpec((tb, tf), lambda i, j: (i, j)),
            input_output_aliases={0: 0},      # out aliases x (saves an HBM buffer
                                              # when the caller donates x)
            cost_estimate=cost,
            compiler_params=cparams,
        )(x2, pe2)

    if single_buffer_pe:
        try:
            out = _run(pl.Buffered(1))        # constant pe block: single-buffer it
        except Exception:
            out = _run(None)                  # fall back to default double-buffering
    else:
        out = _run(None)

    return out.reshape(B, S, D)


# ----------------------------- main ------------------------------------------

if __name__ == "__main__":
    MAX_LEN = 5000
    key = jax.random.PRNGKey(0)

    # 1) Module-scale shape (batch=2, seq=8, d_model=32) -- force the kernel path
    #    (the fast path would otherwise handle this KB-scale call in plain XLA).
    B1, S1, D1 = 2, 8, 32
    k1, k2 = jax.random.split(key)
    x1 = jax.random.normal(k1, (B1, S1, D1), jnp.float32)
    pe1 = make_positional_encoding(D1, MAX_LEN)
    out1 = positional_encoding(x1, pe1, force_kernel=True)
    jax.block_until_ready(out1)
    ref1 = x1 + pe1[:, :S1, :]
    assert out1.shape == (B1, S1, D1) and out1.dtype == jnp.float32
    assert jnp.allclose(out1, ref1, atol=1e-6, rtol=1e-6), "mismatch vs reference (small)"

    # 2) Larger shape to exercise the multi-step parallel grid / tile-splitting path.
    B2, S2, D2 = 64, 128, 64
    x2 = jax.random.normal(k2, (B2, S2, D2), jnp.float32)
    pe2 = make_positional_encoding(D2, MAX_LEN)
    out2 = positional_encoding(x2, pe2, force_kernel=True)
    jax.block_until_ready(out2)
    ref2 = x2 + pe2[:, :S2, :]
    assert jnp.allclose(out2, ref2, atol=1e-6, rtol=1e-6), "mismatch vs reference (large)"

    print("KERNEL_OK")
</pallas_src>

<mosaic_0001>
module attributes {stable_mosaic.version = 11 : i64} {
  func.func @pe_add_kernel(%arg0: i32, %arg1: i32, %arg2: memref<2x256xf32, #tpu.memory_space<vmem>>, %arg3: memref<1x256xf32, #tpu.memory_space<vmem>>, %arg4: memref<2x256xf32, #tpu.memory_space<vmem>>) attributes {dimension_semantics = [#tpu.dimension_semantics<parallel>, #tpu.dimension_semantics<parallel>], iteration_bounds = array<i64: 1, 1>, scalar_prefetch = 0 : i64, scratch_operands = 0 : i64, tpu.core_type = #tpu.core_type<tc>, window_params = [{transform_indices = @transform_0, window_bounds = array<i64: 2, 256>}, {pipeline_mode = #tpu.pipeline_mode<synchronous>, transform_indices = @transform_1, window_bounds = array<i64: 1, 256>}, {transform_indices = @transform_2, window_bounds = array<i64: 2, 256>}]} {
    %c0 = arith.constant 0 : index
    %c0_0 = arith.constant 0 : index
    %0 = vector.load %arg2[%c0, %c0_0] : memref<2x256xf32, #tpu.memory_space<vmem>>, vector<2x256xf32>
    %c0_1 = arith.constant 0 : index
    %c0_2 = arith.constant 0 : index
    %1 = vector.load %arg3[%c0_1, %c0_2] : memref<1x256xf32, #tpu.memory_space<vmem>>, vector<1x256xf32>
    %2 = vector.broadcast %1 : vector<1x256xf32> to vector<2x256xf32>
    %3 = arith.addf %0, %2 : vector<2x256xf32>
    %c0_3 = arith.constant 0 : index
    %c0_4 = arith.constant 0 : index
    %4 = vector.load %arg4[%c0_3, %c0_4] : memref<2x256xf32, #tpu.memory_space<vmem>>, vector<2x256xf32>
    tpu.vector_store %arg4[%c0_3, %c0_4], %3 {strides = array<i32>} : memref<2x256xf32, #tpu.memory_space<vmem>>, vector<2x256xf32>,
    return
  }
  func.func @transform_0(%arg0: i32, %arg1: i32) -> (i32, i32) {
    %c0_i32 = arith.constant 0 : i32
    return %arg0, %arg1 : i32, i32
  }
  func.func @transform_1(%arg0: i32, %arg1: i32) -> (i32, i32) {
    %c0_i32 = arith.constant 0 : i32
    %c0_i32_0 = arith.constant 0 : i32
    return %c0_i32, %arg1 : i32, i32
  }
  func.func @transform_2(%arg0: i32, %arg1: i32) -> (i32, i32) {
    %c0_i32 = arith.constant 0 : i32
    return %arg0, %arg1 : i32, i32
  }
}

module attributes {stable_mosaic.version = 11 : i64} {
  func.func @pe_add_kernel(%arg0: i32, %arg1: i32, %arg2: memref<2x256xf32, #tpu.memory_space<vmem>>, %arg3: memref<1x256xf32, #tpu.memory_space<vmem>>, %arg4: memref<2x256xf32, #tpu.memory_space<vmem>>) attributes {dimension_semantics = [#tpu.dimension_semantics<parallel>, #tpu.dimension_semantics<parallel>], iteration_bounds = array<i64: 1, 1>, scalar_prefetch = 0 : i64, scratch_operands = 0 : i64, tpu.core_type = #tpu.core_type<tc>, window_params = [{transform_indices = @transform_0, window_bounds = array<i64: 2, 256>}, {transform_indices = @transform_1, window_bounds = array<i64: 1, 256>}, {transform_indices = @transform_2, window_bounds = array<i64: 2, 256>}]} {
    %c0 = arith.constant 0 : index
    %c0_0 = arith.constant 0 : index
    %0 = vector.load %arg2[%c0, %c0_0] : memref<2x256xf32, #tpu.memory_space<vmem>>, vector<2x256xf32>
    %c0_1 = arith.constant 0 : index
    %c0_2 = arith.constant 0 : index
    %1 = vector.load %arg3[%c0_1, %c0_2] : memref<1x256xf32, #tpu.memory_space<vmem>>, vector<1x256xf32>
    %2 = vector.broadcast %1 : vector<1x256xf32> to vector<2x256xf32>
    %3 = arith.addf %0, %2 : vector<2x256xf32>
    %c0_3 = arith.constant 0 : index
    %c0_4 = arith.constant 0 : index
    %4 = vector.load %arg4[%c0_3, %c0_4] : memref<2x256xf32, #tpu.memory_space<vmem>>, vector<2x256xf32>
    tpu.vector_store %arg4[%c0_3, %c0_4], %3 {strides = array<i32>} : memref<2x256xf32, #tpu.memory_space<vmem>>, vector<2x256xf32>,
    return
  }
  func.func @transform_0(%arg0: i32, %arg1: i32) -> (i32, i32) {
    %c0_i32 = arith.constant 0 : i32
    return %arg0, %arg1 : i32, i32
  }
  func.func @transform_1(%arg0: i32, %arg1: i32) -> (i32, i32) {
    %c0_i32 = arith.constant 0 : i32
    %c0_i32_0 = arith.constant 0 : i32
    return %c0_i32, %arg1 : i32, i32
  }
  func.func @transform_2(%arg0: i32, %arg1: i32) -> (i32, i32) {
    %c0_i32 = arith.constant 0 : i32
    return %arg0, %arg1 : i32, i32
  }
}

</mosaic_0001>

<bundles_post_ra>
// kernel: tpu_custom_call.1
= control target key start
LH: loop header
LB: loop body
LE: loop exit
PB: predicated region body
PF: predicated region fallthrough
CT: control target
= control target key end

     0   :  { %7 = vsyncpa [#allocation3], 0  ;;  %s135_s0 = inlined_call_operand.hbm [shape: f32[2,256], index: 0, kind: input, shape index: {}, may-alias: {0,2}]   ;;  %s136_s1 = inlined_call_operand.vmem [shape: f32[1,256], index: 1, kind: input, shape index: {}]   ;;  %s137_s2 = inlined_call_operand.hbm [shape: f32[2,256], index: 2, kind: output, shape index: {}, may-alias: {0,2}]  }
   0x1   :  { %8 = vsyncpa [#allocation4], 0  ;;  %s108_s9 = smov [#allocation2]  }
   0x2   :  { %s15_s10 = sshll.u32 %s108_s9, 4  ;;  %s16_s10 = int_to_ptr.vmem [resolvable:$true] %s15_s10 }
   0x3   :  { %s72_s11 = scalar_lea.vmem %s16_s10, 64  ;;  %p77_p1 = scmp.lt.s32.totalorder %s16_s10, %s16_s10 }
   0x4   :  { %p73_p0 = scmp.ne.s32.totalorder %s16_s10, %s72_s11  ;;  %p78_p2 = scmp.lt.s32.totalorder %s72_s11, %s72_s11 }
   0x6   :  { %p79_p3 = por %p78_p2, %p77_p1 }
   0x8   :  { %p80_p4 = pnand %p79_p3, %p73_p0 }
   0xa   :  { %83 = shalt.err (!%p80_p4)
}
   0xb   :  { %18 = dma.hbm_to_vmem [thread:$0]  %s135_s0, 64, %s16_s10, [#allocation3]  }
   0xc   :  { %104 = dma.done.wait [#allocation3], 64  }
   0xd   :  { %105 = vsyncadd [#allocation3], 4294967232  ;;  %v27_v0 = vlaneseq  ;;  %v109_v1 = vmov 1983009808   ;;  %v25_v7 = vld [vmem:[%s136_s1] sm:$0x3] }
   0xe   :  { %v37_v2 = vunpack.c.l.s4 %v109_v1  ;;  %v24_v12 = vld [vmem:[#allocation2] sm:$0xf]  ;;  %s110_s16 = smov [#allocation5]  }
   0xf   :  { %v28_v3 = vshrl.u32 %v27_v0, 7  ;;  %s52_s0 = sshll.u32 %s110_s16, 4  ;;  %s53_s0 = int_to_ptr.vmem [resolvable:$true] %s52_s0 }
  0x10   :  { %v38_v6 = vunpack.c.0.s8 %v37_v2  ;;  %s84_s17 = scalar_lea.vmem %s53_s0, 64  ;;  %p89_p6 = scmp.lt.s32.totalorder %s53_s0, %s53_s0 }
  0x11   :  { %v29_v4 = vsub.s32 0, %v28_v3  ;;  %v33_v5 = vsub.s32 1, %v28_v3  ;;  %p85_p5 = scmp.ne.s32.totalorder %s53_s0, %s84_s17  ;;  %p90_p7 = scmp.lt.s32.totalorder %s84_s17, %s84_s17 }
  0x12   :  { %v41_v10 = vsub.s32 %v38_v6, %v28_v3 }
  0x13   :  { %v30_v8 = vrot.slane %v25_v7, %v29_v4  ;;  %v34_v9 = vrot.slane %v25_v7, %v33_v5  ;;  %p91_p8 = por %p90_p7, %p89_p6 }
  0x15   :  { %v35_v11 = vcombine.low %v30_v8, %v34_v9  ;;  %p92_p9 = pnand %p91_p8, %p85_p5 }
  0x17   :  { %v42_v13 = vrot.slane %v35_v11, %v41_v10 }
  0x19   :  { %v44_v14 = vadd.f32 %v42_v13, %v24_v12 }
  0x1b   :  { %45 = vst [vmem:[#allocation5] sm:$0xf] %v44_v14 }
  0x1c   :  { %95 = shalt.err (!%p92_p9)
}
  0x1d   :  { %55 = dma.vmem_to_hbm [thread:$0]  %s53_s0, 64, %s137_s2, [#allocation4]  }
  0x1e   :  { %106 = dma.done.wait [#allocation4], 64  }
  0x1f   :  { %107 = vsyncadd [#allocation4], 4294967232 }
  0x20   :  { %59 = vsyncpa [#allocation3], 1 }
  0x21   :  { %60 = vsyncpa [#allocation4], 1 }

// kernel: tpu_custom_call.1
= control target key start
LH: loop header
LB: loop body
LE: loop exit
PB: predicated region body
PF: predicated region fallthrough
CT: control target
= control target key end

     0   :  { %7 = vsyncpa [#allocation3], 0  ;;  %s135_s0 = inlined_call_operand.hbm [shape: f32[2,256], index: 0, kind: input, shape index: {}, may-alias: {0,2}]   ;;  %s136_s1 = inlined_call_operand.vmem [shape: f32[1,256], index: 1, kind: input, shape index: {}]   ;;  %s137_s2 = inlined_call_operand.hbm [shape: f32[2,256], index: 2, kind: output, shape index: {}, may-alias: {0,2}]  }
   0x1   :  { %8 = vsyncpa [#allocation4], 0  ;;  %s108_s9 = smov [#allocation2]  }
   0x2   :  { %s15_s10 = sshll.u32 %s108_s9, 4  ;;  %s16_s10 = int_to_ptr.vmem [resolvable:$true] %s15_s10 }
   0x3   :  { %s72_s11 = scalar_lea.vmem %s16_s10, 64  ;;  %p77_p1 = scmp.lt.s32.totalorder %s16_s10, %s16_s10 }
   0x4   :  { %p73_p0 = scmp.ne.s32.totalorder %s16_s10, %s72_s11  ;;  %p78_p2 = scmp.lt.s32.totalorder %s72_s11, %s72_s11 }
   0x6   :  { %p79_p3 = por %p78_p2, %p77_p1 }
   0x8   :  { %p80_p4 = pnand %p79_p3, %p73_p0 }
   0xa   :  { %83 = shalt.err (!%p80_p4)
}
   0xb   :  { %18 = dma.hbm_to_vmem [thread:$0]  %s135_s0, 64, %s16_s10, [#allocation3]  }
   0xc   :  { %104 = dma.done.wait [#allocation3], 64  }
   0xd   :  { %105 = vsyncadd [#allocation3], 4294967232  ;;  %v27_v0 = vlaneseq  ;;  %v109_v1 = vmov 1983009808   ;;  %v25_v7 = vld [vmem:[%s136_s1] sm:$0x3] }
   0xe   :  { %v37_v2 = vunpack.c.l.s4 %v109_v1  ;;  %v24_v12 = vld [vmem:[#allocation2] sm:$0xf]  ;;  %s110_s16 = smov [#allocation5]  }
   0xf   :  { %v28_v3 = vshrl.u32 %v27_v0, 7  ;;  %s52_s0 = sshll.u32 %s110_s16, 4  ;;  %s53_s0 = int_to_ptr.vmem [resolvable:$true] %s52_s0 }
  0x10   :  { %v38_v6 = vunpack.c.0.s8 %v37_v2  ;;  %s84_s17 = scalar_lea.vmem %s53_s0, 64  ;;  %p89_p6 = scmp.lt.s32.totalorder %s53_s0, %s53_s0 }
  0x11   :  { %v29_v4 = vsub.s32 0, %v28_v3  ;;  %v33_v5 = vsub.s32 1, %v28_v3  ;;  %p85_p5 = scmp.ne.s32.totalorder %s53_s0, %s84_s17  ;;  %p90_p7 = scmp.lt.s32.totalorder %s84_s17, %s84_s17 }
  0x12   :  { %v41_v10 = vsub.s32 %v38_v6, %v28_v3 }
  0x13   :  { %v30_v8 = vrot.slane %v25_v7, %v29_v4  ;;  %v34_v9 = vrot.slane %v25_v7, %v33_v5  ;;  %p91_p8 = por %p90_p7, %p89_p6 }
  0x15   :  { %v35_v11 = vcombine.low %v30_v8, %v34_v9  ;;  %p92_p9 = pnand %p91_p8, %p85_p5 }
  0x17   :  { %v42_v13 = vrot.slane %v35_v11, %v41_v10 }
  0x19   :  { %v44_v14 = vadd.f32 %v42_v13, %v24_v12 }
  0x1b   :  { %45 = vst [vmem:[#allocation5] sm:$0xf] %v44_v14 }
  0x1c   :  { %95 = shalt.err (!%p92_p9)
}
  0x1d   :  { %55 = dma.vmem_to_hbm [thread:$0]  %s53_s0, 64, %s137_s2, [#allocation4]  }
  0x1e   :  { %106 = dma.done.wait [#allocation4], 64  }
  0x1f   :  { %107 = vsyncadd [#allocation4], 4294967232 }
  0x20   :  { %59 = vsyncpa [#allocation3], 1 }
  0x21   :  { %60 = vsyncpa [#allocation4], 1 }

</bundles_post_ra>
